<compile_context>
chip_gen: v6e
topology: v6e:2x2x1
jax: 0.10.0
libtpu: 0.0.40
codegen_flags: <defaults>
</compile_context>

<pallas_src>
import functools

import jax
import jax.numpy as jnp
from jax import lax
from jax.experimental import pallas as pl
from jax.experimental.pallas import tpu as pltpu


def _pick_tile(n, candidates, align):
    """Largest candidate tile that divides n and respects the TPU alignment, else full n."""
    for t in candidates:
        if t <= n and n % t == 0 and t % align == 0:
            return t
    return n


def _scores_tile(im_ref, s_ref):
    """(TM, TN) f32 score tile on the MXU; contract feature dim directly (no s.T)."""
    return lax.dot_general(
        im_ref[...], s_ref[...],
        dimension_numbers=(((1,), (1,)), ((), ())),
        precision=lax.Precision.HIGHEST,
        preferred_element_type=jnp.float32)


def _sum_kernel(im_ref, s_ref, dcol_ref, drow_ref, out_ref, *, margin):
    """Per-row-tile partial sums of cost_s + cost_im (diagonal handled in wrapper)."""
    j = pl.program_id(1)

    t = _scores_tile(im_ref, s_ref) + margin                       # (TM, TN)
    dcol = dcol_ref[...].astype(jnp.float32)                       # (TM, 1)
    drow = drow_ref[...].astype(jnp.float32)                       # (1, TN)
    cost = jnp.maximum(t - dcol, 0.0) + jnp.maximum(t - drow, 0.0)

    partial = jnp.sum(cost, axis=1)                                # (TM,)

    @pl.when(j == 0)
    def _():
        out_ref[...] = jnp.zeros_like(out_ref)

    out_ref[...] += partial[None, None, :]


def _max_kernel(im_ref, s_ref, dcol_ref, drow_ref, rowmax_ref, colmax_ref,
                *, margin, tm, tn):
    """Per-row-tile running row-max and per-(i,j)-tile column-max of the hinge costs."""
    i = pl.program_id(0)
    j = pl.program_id(1)

    scores = _scores_tile(im_ref, s_ref)                           # (TM, TN) f32

    # Single select zeroes the diagonal in BOTH cost matrices: push diag scores to -inf,
    # then relu(margin - inf - d) == 0.
    rr = lax.broadcasted_iota(jnp.int32, scores.shape, 0)
    cc = lax.broadcasted_iota(jnp.int32, scores.shape, 1)
    on_diag = (rr - cc) == (j * tn - i * tm)
    scores = jnp.where(on_diag, -jnp.inf, scores)

    t = scores + margin
    dcol = dcol_ref[...].astype(jnp.float32)                       # (TM, 1)
    drow = drow_ref[...].astype(jnp.float32)                       # (1, TN)
    cost_s = jnp.maximum(t - dcol, 0.0)
    cost_im = jnp.maximum(t - drow, 0.0)

    row_max = jnp.max(cost_s, axis=1)                              # (TM,)
    col_max = jnp.max(cost_im, axis=0)                             # (TN,)

    @pl.when(j == 0)
    def _():
        rowmax_ref[...] = jnp.zeros_like(rowmax_ref)               # costs are >= 0

    # Running per-row max across column tiles (output block resident along j).
    rowmax_ref[...] = jnp.maximum(rowmax_ref[...], row_max[None, None, :])
    # Per-(row-tile, col-tile) column max; each (i, j) block written exactly once,
    # cross-row-tile max is finished in the wrapper (keeps the i axis parallel-safe).
    colmax_ref[...] = col_max[None, None, :]


def contrastive_loss(im, s, margin: float = 0.0, max_violation: bool = False,
                     tm: int | None = None, tn: int | None = None):
    """Pallas TPU implementation of ContrastiveLoss.forward(im, s). Returns a scalar."""
    assert im.ndim == 2 and s.ndim == 2 and im.shape == s.shape
    n, d = im.shape
    margin = float(margin)

    if tm is None:
        tm = _pick_tile(n, (512, 256, 128), 8)     # sublane-aligned row tiles
    if tn is None:
        tn = _pick_tile(n, (512, 256, 128), 128)   # lane-aligned column tiles
    assert n % tm == 0 and n % tn == 0, (n, tm, tn)
    n_i, n_j = n // tm, n // tn

    # Diagonal of the score matrix = rowwise dot(im, s); computed once, O(N*D).
    diag = jnp.sum(im.astype(jnp.float32) * s.astype(jnp.float32), axis=-1)
    dcol = diag.reshape(n, 1)
    drow = diag.reshape(1, n)

    in_specs = [
        pl.BlockSpec((tm, d), lambda i, j: (i, 0)),     # im row tile
        pl.BlockSpec((tn, d), lambda i, j: (j, 0)),     # s column tile
        pl.BlockSpec((tm, 1), lambda i, j: (i, 0)),     # diag for this row tile
        pl.BlockSpec((1, tn), lambda i, j: (0, j)),     # diag for this column tile
    ]
    compiler_params = pltpu.CompilerParams(
        dimension_semantics=("parallel", "arbitrary"))

    if not max_violation:
        kernel = functools.partial(_sum_kernel, margin=margin)
        out = pl.pallas_call(
            kernel,
            out_shape=jax.ShapeDtypeStruct((n_i, 1, tm), jnp.float32),
            grid_spec=pltpu.PrefetchScalarGridSpec(
                num_scalar_prefetch=0,
                grid=(n_i, n_j),
                in_specs=in_specs,
                out_specs=pl.BlockSpec((1, 1, tm), lambda i, j: (i, 0, 0)),
            ),
            compiler_params=compiler_params,
        )(im, s, dcol, drow)
        # Exact correction for the (unmasked) diagonal: each diag entry of each of the
        # two cost matrices contributes max(margin, 0).
        return jnp.sum(out) - 2.0 * n * max(margin, 0.0)

    kernel = functools.partial(_max_kernel, margin=margin, tm=tm, tn=tn)
    rowmax, colmax = pl.pallas_call(
        kernel,
        out_shape=[jax.ShapeDtypeStruct((n_i, 1, tm), jnp.float32),
                   jax.ShapeDtypeStruct((n_i, 1, n), jnp.float32)],
        grid_spec=pltpu.PrefetchScalarGridSpec(
            num_scalar_prefetch=0,
            grid=(n_i, n_j),
            in_specs=in_specs,
            out_specs=[pl.BlockSpec((1, 1, tm), lambda i, j: (i, 0, 0)),
                       pl.BlockSpec((1, 1, tn), lambda i, j: (i, 0, j))],
        ),
        compiler_params=compiler_params,
    )(im, s, dcol, drow)
    # Tiny O(N) epilogue: finish the cross-row-tile column max and the final sums.
    return jnp.sum(rowmax) + jnp.sum(jnp.max(colmax, axis=0))


def contrastive_loss_ref(im, s, margin: float = 0.0, max_violation: bool = False):
    """Plain JAX reference mirroring the PyTorch forward."""
    scores = jnp.dot(im.astype(jnp.float32), s.astype(jnp.float32).T,
                     precision=lax.Precision.HIGHEST)
    diag = jnp.diag(scores).reshape(-1, 1)
    cost_s = jnp.maximum(margin + scores - diag, 0.0)
    cost_im = jnp.maximum(margin + scores - diag.T, 0.0)
    eye = jnp.eye(scores.shape[0], dtype=bool)
    cost_s = jnp.where(eye, 0.0, cost_s)
    cost_im = jnp.where(eye, 0.0, cost_im)
    if max_violation:
        return jnp.sum(jnp.max(cost_s, axis=1)) + jnp.sum(jnp.max(cost_im, axis=0))
    return jnp.sum(cost_s) + jnp.sum(cost_im)


if __name__ == "__main__":
    key = jax.random.PRNGKey(0)
    k1, k2, k3, k4 = jax.random.split(key, 4)

    # Small single-tile case: batch of 8 image / sentence embeddings of dim 32.
    im_small = jax.random.normal(k1, (8, 32), dtype=jnp.float32)
    s_small = jax.random.normal(k2, (8, 32), dtype=jnp.float32)

    # Larger case exercising the 2-D tiled / accumulated path (grid 2x2 with 128-tiles).
    im_big = 0.1 * jax.random.normal(k3, (256, 64), dtype=jnp.float32)
    s_big = 0.1 * jax.random.normal(k4, (256, 64), dtype=jnp.float32)

    cases = [
        (im_small, s_small, 0.0, False, None, None),
        (im_small, s_small, 0.2, False, None, None),
        (im_small, s_small, 0.2, True, None, None),
        (im_big, s_big, 0.2, False, 128, 128),
        (im_big, s_big, 0.2, True, 128, 128),
    ]
    for im, s, margin, max_violation, tm, tn in cases:
        loss = contrastive_loss(im, s, margin=margin, max_violation=max_violation,
                                tm=tm, tn=tn)
        loss = jax.block_until_ready(loss)
        ref = contrastive_loss_ref(im, s, margin=margin, max_violation=max_violation)
        assert jnp.allclose(loss, ref, rtol=5e-3, atol=1e-3), (
            margin, max_violation, float(loss), float(ref))

    print("KERNEL_OK")
</pallas_src>

<mosaic_0001>
module attributes {stable_mosaic.version = 11 : i64} {
  func.func @_sum_kernel(%arg0: i32, %arg1: i32, %arg2: memref<8x32xf32, #tpu.memory_space<vmem>>, %arg3: memref<8x32xf32, #tpu.memory_space<vmem>>, %arg4: memref<8x1xf32, #tpu.memory_space<vmem>>, %arg5: memref<1x8xf32, #tpu.memory_space<vmem>>, %arg6: memref<1x1x8xf32, #tpu.memory_space<vmem>>) attributes {dimension_semantics = [#tpu.dimension_semantics<parallel>, #tpu.dimension_semantics<arbitrary>], iteration_bounds = array<i64: 1, 1>, scalar_prefetch = 0 : i64, scratch_operands = 0 : i64, tpu.core_type = #tpu.core_type<tc>, window_params = [{transform_indices = @transform_0, window_bounds = array<i64: 8, 32>}, {transform_indices = @transform_1, window_bounds = array<i64: 8, 32>}, {transform_indices = @transform_2, window_bounds = array<i64: 8, 1>}, {transform_indices = @transform_3, window_bounds = array<i64: 1, 8>}, {transform_indices = @transform_4, window_bounds = array<i64: 1, 1, 8>}]} {
    %c0 = arith.constant 0 : index
    %c0_0 = arith.constant 0 : index
    %0 = vector.load %arg2[%c0, %c0_0] : memref<8x32xf32, #tpu.memory_space<vmem>>, vector<8x32xf32>
    %c0_1 = arith.constant 0 : index
    %c0_2 = arith.constant 0 : index
    %1 = vector.load %arg3[%c0_1, %c0_2] : memref<8x32xf32, #tpu.memory_space<vmem>>, vector<8x32xf32>
    %cst = arith.constant dense<0.000000e+00> : vector<8x8xf32>
    %2 = tpu.matmul %0, %1, %cst {dimension_numbers = #tpu.dot_dimension_numbers<[1], [1], [0], [0], [0, 0, 1, 0], [], []>, precision = #tpu.contract_precision<fp32>} : vector<8x32xf32>, vector<8x32xf32>, vector<8x8xf32> -> vector<8x8xf32>
    %cst_3 = arith.constant 0.000000e+00 : f32
    %3 = vector.broadcast %cst_3 : f32 to vector<8x8xf32>
    %4 = arith.addf %2, %3 : vector<8x8xf32>
    %c0_4 = arith.constant 0 : index
    %c0_5 = arith.constant 0 : index
    %5 = vector.load %arg4[%c0_4, %c0_5] : memref<8x1xf32, #tpu.memory_space<vmem>>, vector<8x1xf32>
    %c0_6 = arith.constant 0 : index
    %c0_7 = arith.constant 0 : index
    %6 = vector.load %arg5[%c0_6, %c0_7] : memref<1x8xf32, #tpu.memory_space<vmem>>, vector<1x8xf32>
    %7 = vector.broadcast %5 : vector<8x1xf32> to vector<8x8xf32>
    %8 = arith.subf %4, %7 : vector<8x8xf32>
    %cst_8 = arith.constant 0.000000e+00 : f32
    %9 = vector.broadcast %cst_8 : f32 to vector<8x8xf32>
    %10 = arith.maximumf %8, %9 : vector<8x8xf32>
    %11 = vector.broadcast %6 : vector<1x8xf32> to vector<8x8xf32>
    %12 = arith.subf %4, %11 : vector<8x8xf32>
    %cst_9 = arith.constant 0.000000e+00 : f32
    %13 = vector.broadcast %cst_9 : f32 to vector<8x8xf32>
    %14 = arith.maximumf %12, %13 : vector<8x8xf32>
    %15 = arith.addf %10, %14 : vector<8x8xf32>
    %cst_10 = arith.constant dense<0.000000e+00> : vector<8xf32>
    %16 = vector.multi_reduction <add>, %15, %cst_10 [1] : vector<8x8xf32> to vector<8xf32>
    %c0_i32 = arith.constant 0 : i32
    %17 = arith.cmpi eq, %arg1, %c0_i32 : i32
    %18 = arith.extui %17 : i1 to i32
    %c0_i32_11 = arith.constant 0 : i32
    %19 = arith.cmpi ne, %18, %c0_i32_11 : i32
    scf.if %19 {
      %cst_18 = arith.constant 0.000000e+00 : f32
      %24 = vector.broadcast %cst_18 : f32 to vector<1x1x8xf32>
      %c0_19 = arith.constant 0 : index
      %c0_20 = arith.constant 0 : index
      %c0_21 = arith.constant 0 : index
      %25 = vector.load %arg6[%c0_19, %c0_20, %c0_21] : memref<1x1x8xf32, #tpu.memory_space<vmem>>, vector<1x1x8xf32>
      tpu.vector_store %arg6[%c0_19, %c0_20, %c0_21], %24 {strides = array<i32>} : memref<1x1x8xf32, #tpu.memory_space<vmem>>, vector<1x1x8xf32>,
    } else {
    }
    %c0_12 = arith.constant 0 : index
    %c0_13 = arith.constant 0 : index
    %c0_14 = arith.constant 0 : index
    %20 = vector.load %arg6[%c0_12, %c0_13, %c0_14] : memref<1x1x8xf32, #tpu.memory_space<vmem>>, vector<1x1x8xf32>
    %21 = vector.shape_cast %16 : vector<8xf32> to vector<1x1x8xf32>
    %22 = arith.addf %20, %21 : vector<1x1x8xf32>
    %c0_15 = arith.constant 0 : index
    %c0_16 = arith.constant 0 : index
    %c0_17 = arith.constant 0 : index
    %23 = vector.load %arg6[%c0_15, %c0_16, %c0_17] : memref<1x1x8xf32, #tpu.memory_space<vmem>>, vector<1x1x8xf32>
    tpu.vector_store %arg6[%c0_15, %c0_16, %c0_17], %22 {strides = array<i32>} : memref<1x1x8xf32, #tpu.memory_space<vmem>>, vector<1x1x8xf32>,
    return
  }
  func.func @transform_0(%arg0: i32, %arg1: i32) -> (i32, i32) {
    %c0_i32 = arith.constant 0 : i32
    %c0_i32_0 = arith.constant 0 : i32
    return %arg0, %c0_i32 : i32, i32
  }
  func.func @transform_1(%arg0: i32, %arg1: i32) -> (i32, i32) {
    %c0_i32 = arith.constant 0 : i32
    %c0_i32_0 = arith.constant 0 : i32
    return %arg1, %c0_i32 : i32, i32
  }
  func.func @transform_2(%arg0: i32, %arg1: i32) -> (i32, i32) {
    %c0_i32 = arith.constant 0 : i32
    %c0_i32_0 = arith.constant 0 : i32
    return %arg0, %c0_i32 : i32, i32
  }
  func.func @transform_3(%arg0: i32, %arg1: i32) -> (i32, i32) {
    %c0_i32 = arith.constant 0 : i32
    %c0_i32_0 = arith.constant 0 : i32
    return %c0_i32, %arg1 : i32, i32
  }
  func.func @transform_4(%arg0: i32, %arg1: i32) -> (i32, i32, i32) {
    %c0_i32 = arith.constant 0 : i32
    %c0_i32_0 = arith.constant 0 : i32
    %c0_i32_1 = arith.constant 0 : i32
    return %arg0, %c0_i32, %c0_i32_0 : i32, i32, i32
  }
}

</mosaic_0001>

<bundles_post_ra>
// kernel: tpu_custom_call.1
= control target key start
LH: loop header
LB: loop body
LE: loop exit
PB: predicated region body
PF: predicated region fallthrough
CT: control target
= control target key end

     0   :  { %9 = vsyncpa [#allocation3], 0  ;;  %s787_s0 = inlined_call_operand.vmem [shape: f32[8,32], index: 0, kind: input, shape index: {}]   ;;  %s788_s1 = inlined_call_operand.hbm [shape: f32[8,32], index: 1, kind: input, shape index: {}]   ;;  %s789_s2 = inlined_call_operand.vmem [shape: f32[8,1], index: 2, kind: input, shape index: {}]   ;;  %s790_s3 = inlined_call_operand.vmem [shape: f32[1,8], index: 3, kind: input, shape index: {}]   ;;  %s791_s4 = inlined_call_operand.hbm [shape: f32[1,1,8], index: 4, kind: output, shape index: {}]  }
   0x1   :  { %10 = vsyncpa [#allocation4], 0  ;;  %s733_s15 = smov [#allocation2]  }
   0x2   :  { %s19_s16 = sshll.u32 %s733_s15, 4  ;;  %s20_s16 = int_to_ptr.vmem [resolvable:$true] %s19_s16 }
   0x3   :  { %s697_s17 = scalar_lea.vmem %s20_s16, 128  ;;  %p702_p1 = scmp.lt.s32.totalorder %s20_s16, %s20_s16 }
   0x4   :  { %p698_p0 = scmp.ne.s32.totalorder %s20_s16, %s697_s17  ;;  %p703_p2 = scmp.lt.s32.totalorder %s697_s17, %s697_s17 }
   0x6   :  { %p704_p3 = por %p703_p2, %p702_p1 }
   0x8   :  { %p705_p4 = pnand %p704_p3, %p698_p0 }
   0xa   :  { %708 = shalt.err (!%p705_p4)
}
   0xb   :  { %22 = dma.hbm_to_vmem [thread:$0]  %s788_s1, 128, %s20_s16, [#allocation3]  }
   0xc   :  { %729 = dma.done.wait [#allocation3], 128  }
   0xd   :  { %730 = vsyncadd [#allocation3], 4294967168  ;;  %vm511_vm0 = vcmask 57344   ;;  %v734_v0 = vmov 0.0   ;;  %vm735_vm1 = vmmov 0   ;;  %v736_v1 = vmov 0  }
   0xe   :  { %512 = vst.msk [vmem:[#allocation5] sm:$0x1] %vm511_vm0, %v734_v0  ;;  %651 = vmatprep.subr.mxu0 %v734_v0  ;;  %653 = vmatprep.mubr.msk.f32.mxu0 %vm735_vm1, %v734_v0  ;;  %vm32_vm2 = vcmask 261120   ;;  %v31_v2 = vld [vmem:[#allocation2] sm:$0xff]  ;;  %vm503_vm3 = vcmask 64512   ;;  %v515_v42 = vlaneseq }
   0xf   :  { %656 = vmatprep.subr.mxu1 %v734_v0  ;;  %658 = vmatprep.mubr.msk.f32.mxu1 %vm735_vm1, %v734_v0  ;;  %v30_v3 = vld [vmem:[%s787_s0] sm:$0xff]  ;;  %v37_v5 = vsel %vm32_vm2, %v31_v2, 0  ;;  %v737_v46 = vmov 1966171168  }
  0x10   :  { %687 = vset.pattern.permute.xlu0 %v736_v1  ;;  %688 = vset.pattern.permute.xlu1 %v736_v1  ;;  %v485_v4 = vld [vmem:[%s789_s2] sm:$0xff]  ;;  %v34_v6 = vsel %vm32_vm2, %v30_v3, 0  ;;  %v70_v7 = vand.u32 4294901760, %v37_v5  ;;  %v516_v43 = vshrl.u32 %v515_v42, 7  ;;  %v600_v44 = vand.u32 127, %v515_v42 }
  0x11   :  { %489 = vperm.xlu0 %687, %v485_v4   ;;  %v105_v8 = vand.u32 4294901760, %v34_v6  ;;  %v638_v32 = vld [vmem:[%s790_s3] ss:$0 sm:$0xff]  ;;  %v552_v47 = vunpack.c.l.s4 %v737_v46  ;;  %s738_s3 = smov [#allocation5]  }
  0x12   :  { %652 = vmatpush3.xpose.msra.mxu0 %v70_v7  ;;  %v147_v10 = vsub.f32 %v37_v5, %v70_v7  ;;  %v603_v45 = vsub.s32 %v600_v44, %v516_v43  ;;  %v517_v49 = vsub.s32 0, %v516_v43  ;;  %v521_v50 = vsub.s32 1, %v516_v43  ;;  %s629_s23 = sshll.u32 %s738_s3, 4  ;;  %s630_s23 = int_to_ptr.vmem [resolvable:$true] %s629_s23 }
  0x13   :  { %v106_v9 = vsub.f32 %v34_v6, %v105_v8  ;;  %661 = vmatprep.subr.mxu0 %v734_v0  ;;  %v553_v48 = vunpack.c.0.s8 %v552_v47  ;;  %v525_v51 = vsub.s32 2, %v516_v43  ;;  %v529_v52 = vsub.s32 3, %v516_v43  ;;  %s709_s24 = scalar_lea.vmem %s630_s23, 16  ;;  %s713_s25 = scalar_lea.vmem %s630_s23, 32 }
  0x14   :  { %v148_v12 = vand.u32 4294901760, %v147_v10  ;;  %v533_v53 = vsub.s32 4, %v516_v43  ;;  %v537_v54 = vsub.s32 5, %v516_v43  ;;  %v541_v55 = vsub.s32 6, %v516_v43  ;;  %p710_p5 = scmp.ne.s32.totalorder %s630_s23, %s709_s24  ;;  %p714_p6 = scmp.lt.s32.totalorder %s630_s23, %s630_s23 }
  0x15   :  { %v107_v11 = vand.u32 4294901760, %v106_v9  ;;  %v545_v56 = vsub.s32 7, %v516_v43  ;;  %v556_v58 = vsub.s32 %v553_v48, %v516_v43  ;;  %p715_p7 = scmp.lt.s32.totalorder %s713_s25, %s709_s24 }
  0x16   :  { %v149_v14 = vsub.f32 %v147_v10, %v148_v12 }
  0x17   :  { %v108_v13 = vsub.f32 %v106_v9, %v107_v11  ;;  %p716_p8 = por %p715_p7, %p714_p6 }
  0x18   :  { %v150_v16 = vand.u32 4294901760, %v149_v14 }
  0x19   :  { %v109_v15 = vand.u32 4294901760, %v108_v13  ;;  %p717_p9 = pnand %p716_p8, %p710_p5 }
  0x1a   :  { %657 = vmatpush3.xpose.msra.mxu1 %v150_v16 }
  0x1b   :  { %654 = vmatmul.mubr.f32.vlgmr.msra.gmra.mxu0 %v109_v15  ;;  %666 = vmatprep.subr.mxu1 %v734_v0 }
  0x1c   :  { %662 = vmatpush3.xpose.msra.mxu0 %v147_v10  ;;  %663 = vmatprep.mubr.msk.f32.mxu0 %vm735_vm1, %v734_v0 }
  0x1d   :  { %671 = vmatprep.subr.mxu0 %v734_v0  ;;  %659 = vmatmul.mubr.f32.vlgmr.msra.gmra.mxu1 %v105_v8 }
  0x1e   :  { %667 = vmatpush3.xpose.msra.mxu1 %v70_v7  ;;  %668 = vmatprep.mubr.msk.f32.mxu1 %vm735_vm1, %v734_v0 }
  0x1f   :  { %664 = vmatmul.mubr.f32.vlgmr.msra.gmra.mxu0 %v106_v9  ;;  %676 = vmatprep.subr.mxu1 %v734_v0 }
  0x20   :  { %672 = vmatpush3.xpose.msra.mxu0 %v148_v12  ;;  %673 = vmatprep.mubr.msk.f32.mxu0 %vm735_vm1, %v734_v0 }
  0x21   :  { %669 = vmatmul.mubr.f32.vlgmr.msra.gmra.mxu1 %v107_v11 }
  0x22   :  { %677 = vmatpush3.xpose.msra.mxu1 %v70_v7  ;;  %678 = vmatprep.mubr.msk.f32.mxu1 %vm735_vm1, %v734_v0 }
  0x23   :  { %674 = vmatmul.mubr.f32.vlgmr.msra.gmra.mxu0 %v105_v8 }
  0x25   :  { %679 = vmatmul.mubr.f32.vlgmr.msra.gmra.mxu1 %v105_v8 }
  0x8c   :  { %v490_v33 = vpop.permute.xlu0 %489 }
  0xdb   :  { %v111_v17 = vpop.f32.mrf.mxu0 }
  0xdd   :  { %v655_v18 = vpop.f32.mrf.mxu0  ;;  %v187_v19 = vpop.f32.mrf.mxu1 }
  0xde   :  { %v188_v20 = vadd.f32 %v187_v19, %v111_v17  ;;  %v513_v19 = vld [vmem:[#allocation5] sm:$0x1] }
  0xdf   :  { %v261_v21 = vpop.f32.mrf.mxu0  ;;  %v660_v22 = vpop.f32.mrf.mxu1 }
  0xe0   :  { %v262_v23 = vadd.f32 %v261_v21, %v188_v20 }
  0xe1   :  { %v665_v24 = vpop.f32.mrf.mxu0  ;;  %v335_v25 = vpop.f32.mrf.mxu1 }
  0xe2   :  { %v336_v26 = vadd.f32 %v335_v25, %v262_v23 }
  0xe3   :  { %v409_v27 = vpop.f32.mrf.mxu0  ;;  %v670_v28 = vpop.f32.mrf.mxu1 }
  0xe4   :  { %v410_v29 = vadd.f32 %v409_v27, %v336_v26 }
  0xe5   :  { %v675_v30 = vpop.f32.mrf.mxu0  ;;  %v481_v31 = vpop.f32.mrf.mxu1 }
  0xe6   :  { %v482_v34 = vadd.f32 %v481_v31, %v410_v29 }
  0xe7   :  { %v680_v35 = vpop.f32.mrf.mxu1 }
  0xe8   :  { %v500_v36 = vsub.f32 %v482_v34, %v638_v32  ;;  %v492_v37 = vsub.f32 %v482_v34, %v490_v33 }
  0xea   :  { %v501_v38 = vmax.f32 %v500_v36, 0.0  ;;  %v493_v39 = vmax.f32 %v492_v37, 0.0 }
  0xec   :  { %v502_v40 = vadd.f32 %v501_v38, %v493_v39 }
  0xee   :  { %v504_v41 = vsel %vm503_vm3, %v502_v40, 0.0 }
  0xef   :  { %505 = vadd.xlane.f32.xlu0 %v504_v41 }
 0x178   :  { %v506_v57 = vpop.xlane.xlu0 %505 }
 0x179   :  { %v518_v59 = vrot.slane %v506_v57, %v517_v49  ;;  %v522_v60 = vrot.slane %v506_v57, %v521_v50  ;;  %v526_v61 = vrot.slane %v506_v57, %v525_v51  ;;  %v530_v62 = vrot.slane %v506_v57, %v529_v52 }
 0x17a   :  { %v534_v63 = vrot.slane %v506_v57, %v533_v53  ;;  %v538_v0 = vrot.slane %v506_v57, %v537_v54  ;;  %v542_v1 = vrot.slane %v506_v57, %v541_v55  ;;  %v546_v2 = vrot.slane %v506_v57, %v545_v56 }
 0x17b   :  { %v547_v3 = vcombine.low %v518_v59, %v522_v60  ;;  %v548_v4 = vcombine.low %v526_v61, %v530_v62 }
 0x17c   :  { %v549_v5 = vcombine.low %v534_v63, %v538_v0  ;;  %v550_v6 = vcombine.low %v542_v1, %v546_v2 }
 0x17d   :  { %v557_v7 = vrot.slane %v547_v3, %v556_v58  ;;  %v564_v8 = vrot.slane %v548_v4, %v556_v58 }
 0x17e   :  { %v571_v9 = vrot.slane %v549_v5, %v556_v58  ;;  %v578_v10 = vrot.slane %v550_v6, %v556_v58 }
 0x17f   :  { %v579_v11 = vcombine.low %v557_v7, %v564_v8 }
 0x180   :  { %v580_v12 = vcombine.low %v571_v9, %v578_v10 }
 0x181   :  { %v587_v13 = vrot.slane %v579_v11, %v556_v58 }
 0x182   :  { %v594_v14 = vrot.slane %v580_v12, %v556_v58 }
 0x184   :  { %v595_v15 = vcombine.low %v587_v13, %v594_v14 }
 0x186   :  { %597 = vperm.xlu1 %688, %v595_v15  }
 0x201   :  { %v598_v16 = vpop.permute.xlu1 %597 }
 0x202   :  { %v604_v17 = vrot.slane %v598_v16, %v603_v45 }
 0x204   :  { %v611_v18 = vrot.slane %v604_v17, %v556_v58 }
 0x206   :  { %v618_v20 = vrot.slane %v611_v18, %v556_v58 }
 0x208   :  { %v620_v21 = vadd.f32 %v618_v20, %v513_v19 }
 0x20a   :  { %622 = vst.msk [vmem:[#allocation5] sm:$0x1] %vm511_vm0, %v620_v21 }
 0x20b   :  { %720 = shalt.err (!%p717_p9)
}
 0x20c   :  { %632 = dma.vmem_to_hbm [thread:$0]  %s630_s23, 16, %s791_s4, [#allocation4]  }
 0x20d   :  { %731 = dma.done.wait [#allocation4], 16  }
 0x20e   :  { %732 = vsyncadd [#allocation4], 4294967280 }
 0x20f   :  { %636 = vsyncpa [#allocation3], 1 }
 0x210   :  { %637 = vsyncpa [#allocation4], 1 }

</bundles_post_ra>
